<compile_context>
chip_gen: v7x
topology: tpu7x:2x2x1
jax: 0.10.0
libtpu: 0.0.40
codegen_flags: <defaults>
</compile_context>

<pallas_src>
import math
from itertools import combinations_with_replacement

import jax
import jax.numpy as jnp
from jax.experimental import pallas as pl
from jax.experimental.pallas import tpu as pltpu

DEGREE = 2
INPUT_DIM = 5          # matches `k = 5` in the reference script
NUM_ACC = 2            # independent partial accumulators (break add chain)

# Monomial index tuples in the exact order torch's PolynomialFeatures emits:
# all degree-1 terms, then all degree-2 combinations with replacement.
COMBOS = []
for _d in range(1, DEGREE + 1):
    COMBOS.extend(combinations_with_replacement(range(INPUT_DIM), _d))
POLY_DIM = len(COMBOS)  # = 5 + 15 = 20 for input_dim=5, degree=2


def _round_up(n, m):
    return ((n + m - 1) // m) * m


def _poly_reg_kernel(x_ref, w_ref, b_ref, out_ref):
    # x_ref  : (F, TB) f32 VMEM   -- batch on lanes (lane-dense rows)
    # w_ref  : (P,)    f32 SMEM   -- linear.weight[0, :] in COMBOS order
    # b_ref  : (1,)    f32 SMEM   -- linear.bias
    # out_ref: (1, TB) f32 VMEM   -- lane-dense output tile
    rows = [x_ref[i:i + 1, :] for i in range(INPUT_DIM)]   # each (1, TB)

    # Horner-factored degree-2 evaluation with the degree-1 weights folded in:
    #   out = b + sum_i rows[i] * (w1[i] + sum_{j>=i} w2[(i,j)] * rows[j])
    # COMBOS order => degree-2 weights for a fixed i are contiguous.
    accs = [None] * NUM_ACC
    q = INPUT_DIM                      # running index into degree-2 weights
    for i in range(INPUT_DIM):
        inner = rows[i] * w_ref[q]     # (i, i) term seeds the inner sum
        q += 1
        for j in range(i + 1, INPUT_DIM):
            inner = inner + rows[j] * w_ref[q]
            q += 1
        inner = inner + w_ref[i]       # fold the degree-1 weight
        term = rows[i] * inner
        a = i % NUM_ACC                # independent accumulators for ILP
        accs[a] = term if accs[a] is None else accs[a] + term

    acc = accs[0]
    for extra in accs[1:]:
        if extra is not None:
            acc = acc + extra
    out_ref[...] = acc + b_ref[0]


def polynomial_regression_forward(x, weight, bias, *, batch_tile=131072):
    """x: (B, F) f32; weight: (P,) f32; bias: (1,) f32 -> (B,) f32.

    batch_tile: lanes per grid step (multiple of 128). Default keeps the
    double-buffered working set well under v7x's 32 MiB scoped VMEM while
    amortizing the ~0.35us per-grid-step overhead.
    """
    B, F = x.shape
    assert F == INPUT_DIM, f"expected {INPUT_DIM} input features, got {F}"
    weight = weight.reshape(-1).astype(jnp.float32)
    bias = bias.reshape(-1).astype(jnp.float32)

    # Transpose so batch is the (fast) lane axis; pad batch to a tile multiple.
    xt = x.T                                        # (F, B)
    tb = min(batch_tile, _round_up(B, 128))
    bp = _round_up(B, tb)
    if bp != B:
        xt = jnp.pad(xt, ((0, 0), (0, bp - B)))

    out = pl.pallas_call(
        _poly_reg_kernel,
        out_shape=jax.ShapeDtypeStruct((1, bp), jnp.float32),
        grid_spec=pltpu.PrefetchScalarGridSpec(
            num_scalar_prefetch=0,
            grid=(bp // tb,),
            in_specs=[
                pl.BlockSpec((INPUT_DIM, tb), lambda i: (0, i)),       # x tile
                pl.BlockSpec(memory_space=pltpu.MemorySpace.SMEM),     # weight
                pl.BlockSpec(memory_space=pltpu.MemorySpace.SMEM),     # bias
            ],
            out_specs=pl.BlockSpec((1, tb), lambda i: (0, i)),
        ),
        compiler_params=pltpu.CompilerParams(
            dimension_semantics=("parallel",),   # batch axis: megacore on v7x
        ),
    )(xt, weight, bias)

    # torch: output.squeeze() on (B, 1) -> (B,)
    return out[0, :B]


def _reference_forward(x, weight, bias):
    """Pure-JAX reference of the PyTorch forward pass (poly expand + linear)."""
    terms = []
    for combo in COMBOS:
        t = jnp.ones((x.shape[0],), dtype=jnp.float32)
        for fi in combo:
            t = t * x[:, fi]
        terms.append(t)
    poly = jnp.stack(terms, axis=1)                 # (B, P)
    return poly @ weight.reshape(-1) + bias.reshape(-1)[0]


if __name__ == "__main__":
    key = jax.random.PRNGKey(0)
    kx, kw, kb = jax.random.split(key, 3)

    BATCH = 8
    x = jax.random.normal(kx, (BATCH, INPUT_DIM), dtype=jnp.float32)

    # Deterministic parameter init mimicking nn.Linear(poly_dim, 1):
    # uniform(-1/sqrt(fan_in), 1/sqrt(fan_in)) for weight and bias.
    bound = 1.0 / math.sqrt(POLY_DIM)
    weight = jax.random.uniform(kw, (POLY_DIM,), jnp.float32, -bound, bound)
    bias = jax.random.uniform(kb, (1,), jnp.float32, -bound, bound)

    out = jax.block_until_ready(polynomial_regression_forward(x, weight, bias))
    ref = _reference_forward(x, weight, bias)
    assert out.shape == (BATCH,)
    assert jnp.allclose(out, ref, atol=1e-5, rtol=1e-5), (out, ref)

    # Second check: batch not a multiple of 128, small tile -> multi-step grid
    # (exercises padding + BlockSpec pipelining path).
    B2 = 300
    x2 = jax.random.normal(jax.random.PRNGKey(1), (B2, INPUT_DIM), jnp.float32)
    out2 = jax.block_until_ready(
        polynomial_regression_forward(x2, weight, bias, batch_tile=128))
    ref2 = _reference_forward(x2, weight, bias)
    assert out2.shape == (B2,)
    assert jnp.allclose(out2, ref2, atol=1e-5, rtol=1e-5), (out2, ref2)

    print("KERNEL_OK")
</pallas_src>

<mosaic_0001>
module attributes {stable_mosaic.version = 11 : i64} {
  func.func @_poly_reg_kernel(%arg0: i32, %arg1: memref<5x128xf32, #tpu.memory_space<vmem>>, %arg2: memref<20xf32, #tpu.memory_space<smem>>, %arg3: memref<1xf32, #tpu.memory_space<smem>>, %arg4: memref<1x128xf32, #tpu.memory_space<vmem>>) attributes {dimension_semantics = [#tpu.dimension_semantics<parallel>], iteration_bounds = array<i64: 1>, scalar_prefetch = 0 : i64, scratch_operands = 0 : i64, tpu.core_type = #tpu.core_type<tc>, window_params = [{transform_indices = @transform_0, window_bounds = array<i64: 5, 128>}, {transform_indices = @transform_1, window_bounds = array<i64: 20>}, {transform_indices = @transform_2, window_bounds = array<i64: 1>}, {transform_indices = @transform_3, window_bounds = array<i64: 1, 128>}]} {
    %c0 = arith.constant 0 : index
    %c0_0 = arith.constant 0 : index
    %0 = vector.load %arg1[%c0, %c0_0] : memref<5x128xf32, #tpu.memory_space<vmem>>, vector<1x128xf32>
    %c1 = arith.constant 1 : index
    %c0_1 = arith.constant 0 : index
    %1 = vector.load %arg1[%c1, %c0_1] : memref<5x128xf32, #tpu.memory_space<vmem>>, vector<1x128xf32>
    %c2 = arith.constant 2 : index
    %c0_2 = arith.constant 0 : index
    %2 = vector.load %arg1[%c2, %c0_2] : memref<5x128xf32, #tpu.memory_space<vmem>>, vector<1x128xf32>
    %c3 = arith.constant 3 : index
    %c0_3 = arith.constant 0 : index
    %3 = vector.load %arg1[%c3, %c0_3] : memref<5x128xf32, #tpu.memory_space<vmem>>, vector<1x128xf32>
    %c4 = arith.constant 4 : index
    %c0_4 = arith.constant 0 : index
    %4 = vector.load %arg1[%c4, %c0_4] : memref<5x128xf32, #tpu.memory_space<vmem>>, vector<1x128xf32>
    %c5 = arith.constant 5 : index
    %5 = memref.load %arg2[%c5] : memref<20xf32, #tpu.memory_space<smem>>
    %6 = vector.broadcast %5 : f32 to vector<1x128xf32>
    %7 = arith.mulf %0, %6 : vector<1x128xf32>
    %c6 = arith.constant 6 : index
    %8 = memref.load %arg2[%c6] : memref<20xf32, #tpu.memory_space<smem>>
    %9 = vector.broadcast %8 : f32 to vector<1x128xf32>
    %10 = arith.mulf %1, %9 : vector<1x128xf32>
    %11 = arith.addf %7, %10 : vector<1x128xf32>
    %c7 = arith.constant 7 : index
    %12 = memref.load %arg2[%c7] : memref<20xf32, #tpu.memory_space<smem>>
    %13 = vector.broadcast %12 : f32 to vector<1x128xf32>
    %14 = arith.mulf %2, %13 : vector<1x128xf32>
    %15 = arith.addf %11, %14 : vector<1x128xf32>
    %c8 = arith.constant 8 : index
    %16 = memref.load %arg2[%c8] : memref<20xf32, #tpu.memory_space<smem>>
    %17 = vector.broadcast %16 : f32 to vector<1x128xf32>
    %18 = arith.mulf %3, %17 : vector<1x128xf32>
    %19 = arith.addf %15, %18 : vector<1x128xf32>
    %c9 = arith.constant 9 : index
    %20 = memref.load %arg2[%c9] : memref<20xf32, #tpu.memory_space<smem>>
    %21 = vector.broadcast %20 : f32 to vector<1x128xf32>
    %22 = arith.mulf %4, %21 : vector<1x128xf32>
    %23 = arith.addf %19, %22 : vector<1x128xf32>
    %c0_5 = arith.constant 0 : index
    %24 = memref.load %arg2[%c0_5] : memref<20xf32, #tpu.memory_space<smem>>
    %25 = vector.broadcast %24 : f32 to vector<1x128xf32>
    %26 = arith.addf %23, %25 : vector<1x128xf32>
    %27 = arith.mulf %0, %26 : vector<1x128xf32>
    %c10 = arith.constant 10 : index
    %28 = memref.load %arg2[%c10] : memref<20xf32, #tpu.memory_space<smem>>
    %29 = vector.broadcast %28 : f32 to vector<1x128xf32>
    %30 = arith.mulf %1, %29 : vector<1x128xf32>
    %c11 = arith.constant 11 : index
    %31 = memref.load %arg2[%c11] : memref<20xf32, #tpu.memory_space<smem>>
    %32 = vector.broadcast %31 : f32 to vector<1x128xf32>
    %33 = arith.mulf %2, %32 : vector<1x128xf32>
    %34 = arith.addf %30, %33 : vector<1x128xf32>
    %c12 = arith.constant 12 : index
    %35 = memref.load %arg2[%c12] : memref<20xf32, #tpu.memory_space<smem>>
    %36 = vector.broadcast %35 : f32 to vector<1x128xf32>
    %37 = arith.mulf %3, %36 : vector<1x128xf32>
    %38 = arith.addf %34, %37 : vector<1x128xf32>
    %c13 = arith.constant 13 : index
    %39 = memref.load %arg2[%c13] : memref<20xf32, #tpu.memory_space<smem>>
    %40 = vector.broadcast %39 : f32 to vector<1x128xf32>
    %41 = arith.mulf %4, %40 : vector<1x128xf32>
    %42 = arith.addf %38, %41 : vector<1x128xf32>
    %c1_6 = arith.constant 1 : index
    %43 = memref.load %arg2[%c1_6] : memref<20xf32, #tpu.memory_space<smem>>
    %44 = vector.broadcast %43 : f32 to vector<1x128xf32>
    %45 = arith.addf %42, %44 : vector<1x128xf32>
    %46 = arith.mulf %1, %45 : vector<1x128xf32>
    %c14 = arith.constant 14 : index
    %47 = memref.load %arg2[%c14] : memref<20xf32, #tpu.memory_space<smem>>
    %48 = vector.broadcast %47 : f32 to vector<1x128xf32>
    %49 = arith.mulf %2, %48 : vector<1x128xf32>
    %c15 = arith.constant 15 : index
    %50 = memref.load %arg2[%c15] : memref<20xf32, #tpu.memory_space<smem>>
    %51 = vector.broadcast %50 : f32 to vector<1x128xf32>
    %52 = arith.mulf %3, %51 : vector<1x128xf32>
    %53 = arith.addf %49, %52 : vector<1x128xf32>
    %c16 = arith.constant 16 : index
    %54 = memref.load %arg2[%c16] : memref<20xf32, #tpu.memory_space<smem>>
    %55 = vector.broadcast %54 : f32 to vector<1x128xf32>
    %56 = arith.mulf %4, %55 : vector<1x128xf32>
    %57 = arith.addf %53, %56 : vector<1x128xf32>
    %c2_7 = arith.constant 2 : index
    %58 = memref.load %arg2[%c2_7] : memref<20xf32, #tpu.memory_space<smem>>
    %59 = vector.broadcast %58 : f32 to vector<1x128xf32>
    %60 = arith.addf %57, %59 : vector<1x128xf32>
    %61 = arith.mulf %2, %60 : vector<1x128xf32>
    %62 = arith.addf %27, %61 : vector<1x128xf32>
    %c17 = arith.constant 17 : index
    %63 = memref.load %arg2[%c17] : memref<20xf32, #tpu.memory_space<smem>>
    %64 = vector.broadcast %63 : f32 to vector<1x128xf32>
    %65 = arith.mulf %3, %64 : vector<1x128xf32>
    %c18 = arith.constant 18 : index
    %66 = memref.load %arg2[%c18] : memref<20xf32, #tpu.memory_space<smem>>
    %67 = vector.broadcast %66 : f32 to vector<1x128xf32>
    %68 = arith.mulf %4, %67 : vector<1x128xf32>
    %69 = arith.addf %65, %68 : vector<1x128xf32>
    %c3_8 = arith.constant 3 : index
    %70 = memref.load %arg2[%c3_8] : memref<20xf32, #tpu.memory_space<smem>>
    %71 = vector.broadcast %70 : f32 to vector<1x128xf32>
    %72 = arith.addf %69, %71 : vector<1x128xf32>
    %73 = arith.mulf %3, %72 : vector<1x128xf32>
    %74 = arith.addf %46, %73 : vector<1x128xf32>
    %c19 = arith.constant 19 : index
    %75 = memref.load %arg2[%c19] : memref<20xf32, #tpu.memory_space<smem>>
    %76 = vector.broadcast %75 : f32 to vector<1x128xf32>
    %77 = arith.mulf %4, %76 : vector<1x128xf32>
    %c4_9 = arith.constant 4 : index
    %78 = memref.load %arg2[%c4_9] : memref<20xf32, #tpu.memory_space<smem>>
    %79 = vector.broadcast %78 : f32 to vector<1x128xf32>
    %80 = arith.addf %77, %79 : vector<1x128xf32>
    %81 = arith.mulf %4, %80 : vector<1x128xf32>
    %82 = arith.addf %62, %81 : vector<1x128xf32>
    %83 = arith.addf %82, %74 : vector<1x128xf32>
    %c0_10 = arith.constant 0 : index
    %84 = memref.load %arg3[%c0_10] : memref<1xf32, #tpu.memory_space<smem>>
    %85 = vector.broadcast %84 : f32 to vector<1x128xf32>
    %86 = arith.addf %83, %85 : vector<1x128xf32>
    %c0_11 = arith.constant 0 : index
    %c0_12 = arith.constant 0 : index
    %87 = vector.load %arg4[%c0_11, %c0_12] : memref<1x128xf32, #tpu.memory_space<vmem>>, vector<1x128xf32>
    tpu.vector_store %arg4[%c0_11, %c0_12], %86 {strides = array<i32>} : memref<1x128xf32, #tpu.memory_space<vmem>>, vector<1x128xf32>,
    return
  }
  func.func @transform_0(%arg0: i32) -> (i32, i32) {
    %c0_i32 = arith.constant 0 : i32
    %c0_i32_0 = arith.constant 0 : i32
    return %c0_i32, %arg0 : i32, i32
  }
  func.func @transform_1(%arg0: i32) -> i32 {
    %c0_i32 = arith.constant 0 : i32
    %c0_i32_0 = arith.constant 0 : i32
    return %c0_i32 : i32
  }
  func.func @transform_2(%arg0: i32) -> i32 {
    %c0_i32 = arith.constant 0 : i32
    %c0_i32_0 = arith.constant 0 : i32
    return %c0_i32 : i32
  }
  func.func @transform_3(%arg0: i32) -> (i32, i32) {
    %c0_i32 = arith.constant 0 : i32
    %c0_i32_0 = arith.constant 0 : i32
    return %c0_i32, %arg0 : i32, i32
  }
}

</mosaic_0001>

<bundles_post_ra>
// kernel: tpu_custom_call.1
= control target key start
LH: loop header
LB: loop body
LE: loop exit
PB: predicated region body
PF: predicated region fallthrough
CT: control target
= control target key end

     0   :  { %9 = vsyncpa [#allocation4], 0  ;;  %s354_s0 = inlined_call_operand.hbm [shape: f32[5,128], index: 0, kind: input, shape index: {}]   ;;  %s355_s1 = inlined_call_operand.vmem [shape: f32[20], index: 1, kind: input, shape index: {}]   ;;  %s356_s2 = inlined_call_operand.<no memory space> [shape: f32[1], index: 2, kind: input, shape index: {}]   ;;  %s357_s3 = inlined_call_operand.hbm [shape: f32[1,128], index: 3, kind: output, shape index: {}]  }
   0x1   :  { %10 = vsyncpa [#allocation6], 0 }
   0x2   :  { %11 = vsyncpa [#allocation5], 0  ;;  %s28_s14 = sshll.u32 %s355_s1, 4  ;;  %s229_s15 = smov [#allocation3]   ;;  %s29_s14 = int_to_ptr.vmem [resolvable:$true] %s28_s14 }
   0x3   :  { %s18_s16 = sshll.u32 %s229_s15, 4  ;;  %s167_s19 = scalar_lea.hbm %s354_s0, 128  ;;  %s19_s16 = int_to_ptr.vmem [resolvable:$true] %s18_s16 }
   0x4   :  { %p168_p0 = scmp.ne.s32.totalorder %s354_s0, %s167_s19  ;;  %p171_p1 = scmp.lt.u32.totalorder %s167_s19, %s354_s0 }
   0x6   :  { %p173_p2 = pnand %p171_p1, %p168_p0 }
   0x8   :  { %176 = shalt.err (!%p173_p2)
}
   0x9   :  { %s177_s24 = scalar_lea.vmem %s19_s16, 128  ;;  %p182_p4 = scmp.lt.s32.totalorder %s19_s16, %s19_s16 }
   0xa   :  { %p178_p3 = scmp.ne.s32.totalorder %s19_s16, %s177_s24  ;;  %p183_p5 = scmp.lt.s32.totalorder %s177_s24, %s177_s24 }
   0xc   :  { %p184_p6 = por %p183_p5, %p182_p4 }
   0xe   :  { %p185_p7 = pnand %p184_p6, %p178_p3 }
  0x10   :  { %188 = shalt.err (!%p185_p7)
}
  0x11   :  { %21 = dma.hbm_to_vmem [thread:$0]  %s354_s0, 128, %s19_s16, [#allocation4]  }
  0x12   :  { %s189_s26 = scalar_lea.vmem %s29_s14, 16  ;;  %p194_p9 = scmp.lt.s32.totalorder %s29_s14, %s29_s14 }
  0x13   :  { %p190_p8 = scmp.ne.s32.totalorder %s29_s14, %s189_s26  ;;  %p195_p10 = scmp.lt.s32.totalorder %s189_s26, %s189_s26 }
  0x15   :  { %p196_p11 = por %p195_p10, %p194_p9 }
  0x17   :  { %p197_p12 = pnand %p196_p11, %p190_p8 }
  0x19   :  { %200 = shalt.err (!%p197_p12)
}
  0x1a   :  { %s230_s27 = smov [#allocation7]  }
  0x1b   :  { %31 = dma.vmem_to_smem %s29_s14, 16, %s230_s27, [#allocation6]  }
  0x1c   :  { %223 = dma.done.wait [#allocation4], 128  }
  0x1d   :  { %224 = vsyncadd [#allocation4], 4294967168 }
  0x1e   :  { %225 = dma.done.wait [#allocation6], 16  }
  0x1f   :  { %226 = vsyncadd [#allocation6], 4294967280 }
  0x20   :  { %40 = sfence }
  0x21   :  { %s145_s28 = sld [smem:[#allocation7 + $0x5]]  ;;  %s146_s29 = sld [smem:[#allocation7 + $0x6]]  ;;  %v267_v0 = vld [vmem:[#allocation3] sm:$0x1]  ;;  %v269_v1 = vld [vmem:[#allocation3 + $0x1] sm:$0x1]  ;;  %v126_v63 = vstv %s356_s2 }
  0x22   :  { %s147_s30 = sld [smem:[#allocation7 + $0x7]]  ;;  %s148_s0 = sld [smem:[#allocation7 + $0x8]]  ;;  %v273_v2 = vld [vmem:[#allocation3 + $0x2] sm:$0x1]  ;;  %v279_v3 = vld [vmem:[#allocation3 + $0x3] sm:$0x1] }
  0x23   :  { %s149_s4 = sld [smem:[#allocation7 + $0x9]]  ;;  %s271_s5 = sld [smem:[#allocation7]]  ;;  %v285_v4 = vld [vmem:[#allocation3 + $0x4] sm:$0x1] }
  0x24   :  { %s150_s6 = sld [smem:[#allocation7 + $0xa]]  ;;  %s275_s7 = sld [smem:[#allocation7 + $0xb]] }
  0x25   :  { %s277_s8 = sld [smem:[#allocation7 + $0xc]]  ;;  %s281_s9 = sld [smem:[#allocation7 + $0xd]] }
  0x26   :  { %s283_s10 = sld [smem:[#allocation7 + $0x1]]  ;;  %s287_s11 = sld [smem:[#allocation7 + $0xe]] }
  0x27   :  { %v47_v5 = vstv %s145_s28  ;;  %s289_s12 = sld [smem:[#allocation7 + $0xf]]  ;;  %v50_v7 = vstv %s146_s29  ;;  %s292_s13 = sld [smem:[#allocation7 + $0x10]] }
  0x28   :  { %v48_v6 = vmul.f32 %v47_v5, %v267_v0  ;;  %v54_v8 = vstv %s147_s30  ;;  %s294_s14 = sld [smem:[#allocation7 + $0x2]]  ;;  %v51_v9 = vmul.f32 %v50_v7, %v269_v1  ;;  %v58_v11 = vstv %s148_s0  ;;  %s298_s15 = sld [smem:[#allocation7 + $0x11]] }
  0x29   :  { %v55_v10 = vmul.f32 %v54_v8, %v273_v2  ;;  %v62_v12 = vstv %s149_s4  ;;  %s300_s16 = sld [smem:[#allocation7 + $0x12]]  ;;  %v59_v13 = vmul.f32 %v58_v11, %v279_v3  ;;  %v66_v15 = vstv %s271_s5  ;;  %s305_s17 = sld [smem:[#allocation7 + $0x3]] }
  0x2a   :  { %v63_v14 = vmul.f32 %v62_v12, %v285_v4  ;;  %v70_v16 = vstv %s150_s6  ;;  %s307_s18 = sld [smem:[#allocation7 + $0x13]]  ;;  %v52_v17 = vadd.f32 %v51_v9, %v48_v6  ;;  %v73_v19 = vstv %s275_s7  ;;  %s312_s19 = sld [smem:[#allocation7 + $0x4]] }
  0x2b   :  { %v71_v18 = vmul.f32 %v70_v16, %v269_v1  ;;  %v77_v20 = vstv %s277_s8  ;;  %v74_v21 = vmul.f32 %v73_v19, %v273_v2  ;;  %v81_v23 = vstv %s281_s9  ;;  %s231_s22 = smov [#allocation8]  }
  0x2c   :  { %v78_v22 = vmul.f32 %v77_v20, %v279_v3  ;;  %v85_v24 = vstv %s283_s10  ;;  %v56_v25 = vadd.f32 %v55_v10, %v52_v17  ;;  %v82_v26 = vmul.f32 %v81_v23, %v285_v4  ;;  %s135_s23 = sshll.u32 %s231_s22, 4  ;;  %s136_s23 = int_to_ptr.vmem [resolvable:$true] %s135_s23 }
  0x2d   :  { %v89_v27 = vstv %s287_s11  ;;  %v92_v28 = vstv %s289_s12  ;;  %v75_v29 = vadd.f32 %v74_v21, %v71_v18  ;;  %v96_v32 = vstv %s292_s13  ;;  %s201_s24 = scalar_lea.vmem %s136_s23, 16  ;;  %s205_s1 = scalar_lea.vmem %s136_s23, 32 }
  0x2e   :  { %v90_v30 = vmul.f32 %v89_v27, %v273_v2  ;;  %v93_v31 = vmul.f32 %v92_v28, %v279_v3  ;;  %v60_v33 = vadd.f32 %v59_v13, %v56_v25  ;;  %v97_v34 = vmul.f32 %v96_v32, %v285_v4  ;;  %p202_p13 = scmp.ne.s32.totalorder %s136_s23, %s201_s24  ;;  %p206_p0 = scmp.lt.s32.totalorder %s136_s23, %s136_s23 }
  0x2f   :  { %v100_v35 = vstv %s294_s14  ;;  %v105_v36 = vstv %s298_s15  ;;  %v79_v37 = vadd.f32 %v78_v22, %v75_v29  ;;  %v108_v40 = vstv %s300_s16  ;;  %p207_p1 = scmp.lt.s32.totalorder %s205_s1, %s201_s24 }
  0x30   :  { %v94_v38 = vadd.f32 %v93_v31, %v90_v30  ;;  %v106_v39 = vmul.f32 %v105_v36, %v279_v3  ;;  %v64_v41 = vadd.f32 %v63_v14, %v60_v33  ;;  %v109_v42 = vmul.f32 %v108_v40, %v285_v4 }
  0x31   :  { %v112_v43 = vstv %s305_s17  ;;  %v117_v44 = vstv %s307_s18  ;;  %v83_v45 = vadd.f32 %v82_v26, %v79_v37  ;;  %v120_v48 = vstv %s312_s19  ;;  %p208_p2 = por %p207_p1, %p206_p0 }
  0x32   :  { %v98_v46 = vadd.f32 %v97_v34, %v94_v38  ;;  %v118_v47 = vmul.f32 %v117_v44, %v285_v4  ;;  %v67_v49 = vadd.f32 %v66_v15, %v64_v41  ;;  %v110_v50 = vadd.f32 %v109_v42, %v106_v39 }
  0x33   :  { %v86_v51 = vadd.f32 %v85_v24, %v83_v45  ;;  %p209_p3 = pnand %p208_p2, %p202_p13 }
  0x34   :  { %v101_v52 = vadd.f32 %v100_v35, %v98_v46  ;;  %v121_v53 = vadd.f32 %v120_v48, %v118_v47  ;;  %v68_v54 = vmul.f32 %v67_v49, %v267_v0  ;;  %v113_v55 = vadd.f32 %v112_v43, %v110_v50 }
  0x35   :  { %v87_v56 = vmul.f32 %v86_v51, %v269_v1 }
  0x36   :  { %v102_v57 = vmul.f32 %v101_v52, %v273_v2  ;;  %v122_v58 = vmul.f32 %v121_v53, %v285_v4  ;;  %v114_v59 = vmul.f32 %v113_v55, %v279_v3 }
  0x38   :  { %v103_v60 = vadd.f32 %v102_v57, %v68_v54  ;;  %v115_v61 = vadd.f32 %v114_v59, %v87_v56 }
  0x3a   :  { %v123_v62 = vadd.f32 %v122_v58, %v103_v60 }
  0x3c   :  { %v124_v5 = vadd.f32 %v123_v62, %v115_v61 }
  0x3e   :  { %v127_v0 = vadd.f32 %v126_v63, %v124_v5 }
  0x40   :  { %128 = vst [vmem:[#allocation8] sm:$0x1] %v127_v0 }
  0x41   :  { %212 = shalt.err (!%p209_p3)
}
  0x42   :  { %s213_s27 = scalar_lea.hbm %s357_s3, 16 }
  0x43   :  { %p214_p4 = scmp.ne.s32.totalorder %s357_s3, %s213_s27  ;;  %p217_p5 = scmp.lt.u32.totalorder %s213_s27, %s357_s3 }
  0x45   :  { %p219_p6 = pnand %p217_p5, %p214_p4 }
  0x47   :  { %222 = shalt.err (!%p219_p6)
}
  0x48   :  { %138 = dma.vmem_to_hbm [thread:$0]  %s136_s23, 16, %s357_s3, [#allocation5]  }
  0x49   :  { %227 = dma.done.wait [#allocation5], 16  }
  0x4a   :  { %228 = vsyncadd [#allocation5], 4294967280 }
  0x4b   :  { %142 = vsyncpa [#allocation4], 1 }
  0x4c   :  { %143 = vsyncpa [#allocation5], 1 }
  0x4d   :  { %144 = vsyncpa [#allocation6], 1 }

</bundles_post_ra>
